<compile_context>
chip_gen: v5e
topology: v5e:2x2
jax: 0.10.0
libtpu: 0.0.40
codegen_flags: <defaults>
</compile_context>

<pallas_src>
import functools

import jax
import jax.numpy as jnp
import numpy as np
from jax.experimental import pallas as pl
from jax.experimental.pallas import tpu as pltpu


def _temporal_sim_kernel(x_ref, w_ref, b_ref, adj_ref, y_ref, *, fast_sigmoid):
    """One grid step = `batch_block` batches x all T timesteps.

    x_ref  : (TB, (T + ksize - 1) * N, C)  padded per-batch temporal windows
    w_ref  : (ksize, C, E)                 conv weight, one [C, E] matrix per tap
    b_ref  : (1, E)                        conv bias (f32)
    adj_ref: (TB, T, N, N)                 sigmoid similarity output
    y_ref  : (TB, T*N, E) VMEM scratch     conv output staged for the epilogue
    """
    TB, T, N, _ = adj_ref.shape
    ksize, C, E = w_ref.shape

    # ---- temporal 'same' conv: ksize shifted tap matmuls, f32 accumulation ----
    # Each tap is a sublane-aligned static slice of the resident padded window
    # (no full-window load, no TB-merging reshape -> no duplicated VMEM copies).
    for b in range(TB):                                    # static unroll, TB is small
        acc = jnp.dot(x_ref[b, 0:T * N, :], w_ref[0],
                      preferred_element_type=jnp.float32)
        for k in range(1, ksize):                          # static unroll over taps
            acc = acc + jnp.dot(x_ref[b, k * N:(k + T) * N, :], w_ref[k],
                                preferred_element_type=jnp.float32)
        acc = acc + b_ref[0]                               # bias add in f32 (VPU)
        y_ref[b] = acc.astype(y_ref.dtype)                 # stage y for the epilogue

    # ---- per-(b,t) similarity tiles: MXU dot -> sigmoid -> direct store ----
    # Never materializes the (TB*T, N, N) f32 sim; one (N,N) tile is live at a
    # time, so the compiler can overlap tile i+1's matmul with tile i's
    # sigmoid (EUP) and store.
    for b in range(TB):                                    # static unroll over batches
        def sim_tile(t, carry, b=b):
            row = pl.multiple_of(t * N, N)                 # sublane-aligned (N % 8/16 == 0)
            yt = y_ref[b, pl.ds(row, N), :]                # (N, E), compute dtype
            # y @ y^T with f32 accumulation (RHS contracts on its last dim; the
            # implied per-tile transpose rides the XLU/MXU operand path).
            sim = jax.lax.dot_general(
                yt, yt, dimension_numbers=(((1,), (1,)), ((), ())),
                preferred_element_type=jnp.float32)        # (N, N) f32
            if fast_sigmoid:
                # sigmoid = 1 / (1 + exp(-x)): exp on EUP + approx reciprocal
                # (EUP vrcp slot), all in f32 so it is also v5e-friendly.
                sig = pl.reciprocal(1.0 + jnp.exp(-sim), approx=True)
            else:
                sig = jax.nn.sigmoid(sim)                  # exact f32 path
            adj_ref[b, t] = sig.astype(adj_ref.dtype)
            return carry

        jax.lax.fori_loop(0, T, sim_tile, 0)


def _round_up(v, m):
    return -(-v // m) * m


def _vmem_block_bytes(shape, dtype):
    """VMEM bytes for a block, including (sublane, lane) padding of the last 2 dims."""
    dt = np.dtype(dtype)
    packing = max(1, 4 // dt.itemsize)          # rows packed per 32-bit sublane word
    lead = 1
    for d in shape[:-2]:
        lead *= d
    rows = _round_up(shape[-2], 8 * packing)
    lanes = _round_up(shape[-1], 128)
    return lead * rows * lanes * dt.itemsize


# Working-set target that is safe on v7x (64 MiB physical VMEM per TensorCore);
# v5e/v6e have 128 MiB so this is conservative there.
_V7X_SAFE_VMEM_BUDGET = 48 << 20


def temporal_sim(x, w_conv, b_conv, ksize=3, *,
                 compute_dtype=jnp.bfloat16,
                 out_dtype=jnp.bfloat16,
                 batch_block=None,
                 fast_sigmoid=True,
                 vmem_budget_bytes=_V7X_SAFE_VMEM_BUDGET):
    """x: [B, T, N, C_in]; w_conv: [E, C_in, ksize, 1]; b_conv: [E] -> [B, T, N, N].

    compute_dtype: dtype of the MXU operands (bf16 default halves HBM read
                   traffic; accumulation is always f32).
    out_dtype:     adjacency dtype written back (bf16 default halves the
                   dominant B*T*N*N writeback).
    batch_block:   batches per grid step; None = auto (largest divisor of B
                   that keeps grid >= 2 and fits the VMEM budget).
    fast_sigmoid:  EUP exp + approx reciprocal (default); False = exact f32.
    """
    B, T, N, C = x.shape
    E = w_conv.shape[0]
    # 'same' padding emulation below matches PyTorch only for odd ksize.
    assert ksize % 2 == 1, "TemporalSim Pallas kernel assumes odd ksize ('same' padding)"
    assert w_conv.shape == (E, C, ksize, 1)
    sub = 16 if np.dtype(compute_dtype).itemsize == 2 else 8
    assert N % sub == 0, (
        f"N={N} must be a multiple of {sub} for compute_dtype="
        f"{np.dtype(compute_dtype).name} so the k*N / t*N slices are sublane-aligned "
        "(otherwise every tap pays an XLU relayout of the whole window)")
    pad = ksize // 2
    t_pad = T + 2 * pad

    # ---- batch_block selection: grid >= 2 when possible, VMEM within budget ----
    def step_bytes(tb):
        xb = _vmem_block_bytes((tb, t_pad * N, C), compute_dtype)   # lane-padded to 128
        ob = _vmem_block_bytes((tb * T, N, N), out_dtype)
        yb = _vmem_block_bytes((tb, T * N, E), compute_dtype)       # scratch (single)
        wb = _vmem_block_bytes((ksize, C, E), compute_dtype)
        bias = _vmem_block_bytes((1, E), jnp.float32)
        return 2 * (xb + ob) + yb + wb + bias     # in/out blocks are double-buffered

    cap = max(1, B // 2)                 # keep >= 2 grid steps: both v7x TensorCores
                                         # get work and DMA/compute pipelining survives
    want = cap if batch_block is None else max(1, min(batch_block, cap))
    tb = want
    while tb > 1 and (B % tb != 0 or step_bytes(tb) > vmem_budget_bytes):
        tb -= 1
    assert B % tb == 0
    assert step_bytes(tb) <= vmem_budget_bytes, (
        f"even batch_block=1 needs ~{step_bytes(1) >> 20} MiB VMEM "
        f"(budget {vmem_budget_bytes >> 20} MiB); reduce T/N or raise vmem_budget_bytes")
    est = step_bytes(tb)
    vmem_limit = int(min(max(est + (8 << 20), 32 << 20), 60 << 20))

    # ---- glue (plain JAX, no data duplication) ----
    # Zero-pad T and flatten (T_pad, N) so the kernel slices tap windows along
    # the sublane axis of a single resident block. bf16 cast halves HBM reads.
    x_pad = jnp.pad(x, ((0, 0), (pad, pad), (0, 0), (0, 0))).astype(compute_dtype)
    x_flat = x_pad.reshape(B, t_pad * N, C)
    # W_k[c, e] = w_conv[e, c, k, 0]  (cross-correlation, same as nn.Conv2d)
    w_k = jnp.transpose(w_conv[:, :, :, 0], (2, 1, 0)).astype(compute_dtype)  # [ksize,C,E]
    b2 = b_conv.reshape(1, E).astype(jnp.float32)

    # Scheduling hint for XLA around the custom call.
    flops = 2 * B * T * N * N * E + 2 * B * T * N * C * E * ksize
    transcendentals = B * T * N * N
    bytes_accessed = (x_flat.size * np.dtype(compute_dtype).itemsize
                      + w_k.size * np.dtype(compute_dtype).itemsize
                      + b2.size * 4
                      + B * T * N * N * np.dtype(out_dtype).itemsize)

    kernel = functools.partial(_temporal_sim_kernel, fast_sigmoid=fast_sigmoid)
    grid = (B // tb,)
    adj = pl.pallas_call(
        kernel,
        out_shape=jax.ShapeDtypeStruct((B, T, N, N), out_dtype),
        grid_spec=pltpu.PrefetchScalarGridSpec(
            num_scalar_prefetch=0,
            grid=grid,
            in_specs=[
                # If profiles show exposed input DMA at tiny C, add
                # pipeline_mode=pl.Buffered(3) here (or lay x out lane-dense).
                pl.BlockSpec((tb, t_pad * N, C), lambda i: (i, 0, 0)),
                pl.BlockSpec((ksize, C, E), lambda i: (0, 0, 0)),   # resident weights
                pl.BlockSpec((1, E), lambda i: (0, 0)),             # resident bias
            ],
            # TODO(synk): for production N < 128, switch to a lane-dense
            # (B, T, N*N) out layout (per-tile minor-dim merge in the loop) to
            # avoid masked vst.msk partial stores; kept (B,T,N,N) here because
            # the in-kernel (N,N)->(N*N) relayout is not guaranteed to lower
            # robustly at arbitrary small N.  For N >= 128 this layout is
            # already lane-dense.
            out_specs=pl.BlockSpec((tb, T, N, N), lambda i: (i, 0, 0, 0)),
            scratch_shapes=[pltpu.VMEM((tb, T * N, E), compute_dtype)],
        ),
        compiler_params=pltpu.CompilerParams(
            dimension_semantics=("parallel",),   # batch axis is embarrassingly parallel
            vmem_limit_bytes=vmem_limit,
        ),
        cost_estimate=pl.CostEstimate(
            flops=flops,
            transcendentals=transcendentals,
            bytes_accessed=bytes_accessed,
        ),
    )(x_flat, w_k, b2)

    return adj


def temporal_sim_reference(x, w_conv, b_conv):
    """Pure-JAX reference matching the PyTorch module semantics."""
    xt = jnp.transpose(x, (0, 3, 1, 2))  # [B, C, T, N]  (NCHW)
    y = jax.lax.conv_general_dilated(
        xt, w_conv, window_strides=(1, 1), padding="SAME",
        dimension_numbers=("NCHW", "OIHW", "NCHW"),
    )
    y = y + b_conv[None, :, None, None]
    y = jnp.transpose(y, (0, 2, 3, 1))  # [B, T, N, E]
    return jax.nn.sigmoid(jnp.einsum("btne,btme->btnm", y, y))


if __name__ == "__main__":
    B, T, N, C_in, E, KSIZE = 2, 8, 16, 4, 32, 3

    key = jax.random.PRNGKey(0)
    kx, kw, kb = jax.random.split(key, 3)
    x = jax.random.normal(kx, (B, T, N, C_in), dtype=jnp.float32)
    # Deterministic synthetic Conv2d params: weight [E, C_in, ksize, 1], bias [E]
    w_conv = jax.random.normal(kw, (E, C_in, KSIZE, 1), dtype=jnp.float32) * 0.1
    b_conv = jax.random.normal(kb, (E,), dtype=jnp.float32) * 0.1

    ref = temporal_sim_reference(x, w_conv, b_conv)

    # 1) Exact-semantics check: f32 operands, f32 output, exact sigmoid.
    out = jax.block_until_ready(
        temporal_sim(x, w_conv, b_conv, ksize=KSIZE,
                     compute_dtype=jnp.float32,
                     out_dtype=jnp.float32,
                     fast_sigmoid=False))
    assert out.shape == (B, T, N, N)
    assert jnp.allclose(out, ref, atol=1e-5, rtol=1e-5), (
        f"f32 max abs err {float(jnp.max(jnp.abs(out - ref)))}"
    )

    # 2) Default (bandwidth-optimized) path: bf16 MXU operands + bf16 writeback,
    #    approx-reciprocal sigmoid, f32 accumulation.  batch_block is auto-picked
    #    so grid=(2,) here (both v7x TensorCores busy, pipelining alive).
    out_fast = jax.block_until_ready(temporal_sim(x, w_conv, b_conv, ksize=KSIZE))
    assert out_fast.shape == (B, T, N, N)
    assert out_fast.dtype == jnp.bfloat16
    assert jnp.allclose(out_fast.astype(jnp.float32), ref, atol=3e-2, rtol=0.0), (
        f"bf16 max abs err {float(jnp.max(jnp.abs(out_fast.astype(jnp.float32) - ref)))}"
    )

    print("KERNEL_OK")
</pallas_src>

<mosaic_0001>
module attributes {stable_mosaic.version = 11 : i64} {
  func.func @_temporal_sim_kernel(%arg0: i32, %arg1: memref<1x160x4xf32, #tpu.memory_space<vmem>>, %arg2: memref<3x4x32xf32, #tpu.memory_space<vmem>>, %arg3: memref<1x32xf32, #tpu.memory_space<vmem>>, %arg4: memref<1x8x16x16xf32, #tpu.memory_space<vmem>>, %arg5: memref<1x128x32xf32, #tpu.memory_space<vmem>>) attributes {dimension_semantics = [#tpu.dimension_semantics<parallel>], iteration_bounds = array<i64: 2>, scalar_prefetch = 0 : i64, scratch_operands = 1 : i64, tpu.core_type = #tpu.core_type<tc>, window_params = [{transform_indices = @transform_0, window_bounds = array<i64: 1, 160, 4>}, {pipeline_mode = #tpu.pipeline_mode<synchronous>, transform_indices = @transform_1, window_bounds = array<i64: 3, 4, 32>}, {pipeline_mode = #tpu.pipeline_mode<synchronous>, transform_indices = @transform_2, window_bounds = array<i64: 1, 32>}, {transform_indices = @transform_3, window_bounds = array<i64: 1, 8, 16, 16>}]} {
    %c0 = arith.constant 0 : index
    %c0_0 = arith.constant 0 : index
    %c0_1 = arith.constant 0 : index
    %0 = vector.load %arg1[%c0, %c0_0, %c0_1] : memref<1x160x4xf32, #tpu.memory_space<vmem>>, vector<1x128x4xf32>
    %1 = vector.shape_cast %0 : vector<1x128x4xf32> to vector<128x4xf32>
    %c0_2 = arith.constant 0 : index
    %c0_3 = arith.constant 0 : index
    %c0_4 = arith.constant 0 : index
    %2 = vector.load %arg2[%c0_2, %c0_3, %c0_4] : memref<3x4x32xf32, #tpu.memory_space<vmem>>, vector<1x4x32xf32>
    %3 = vector.shape_cast %2 : vector<1x4x32xf32> to vector<4x32xf32>
    %cst = arith.constant dense<0.000000e+00> : vector<128x32xf32>
    %4 = tpu.matmul %1, %3, %cst {dimension_numbers = #tpu.dot_dimension_numbers<[1], [0], [0], [1], [0, 0, 1, 1], [], []>} : vector<128x4xf32>, vector<4x32xf32>, vector<128x32xf32> -> vector<128x32xf32>
    %c0_5 = arith.constant 0 : index
    %c16 = arith.constant 16 : index
    %c0_6 = arith.constant 0 : index
    %5 = vector.load %arg1[%c0_5, %c16, %c0_6] : memref<1x160x4xf32, #tpu.memory_space<vmem>>, vector<1x128x4xf32>
    %6 = vector.shape_cast %5 : vector<1x128x4xf32> to vector<128x4xf32>
    %c1 = arith.constant 1 : index
    %c0_7 = arith.constant 0 : index
    %c0_8 = arith.constant 0 : index
    %7 = vector.load %arg2[%c1, %c0_7, %c0_8] : memref<3x4x32xf32, #tpu.memory_space<vmem>>, vector<1x4x32xf32>
    %8 = vector.shape_cast %7 : vector<1x4x32xf32> to vector<4x32xf32>
    %cst_9 = arith.constant dense<0.000000e+00> : vector<128x32xf32>
    %9 = tpu.matmul %6, %8, %cst_9 {dimension_numbers = #tpu.dot_dimension_numbers<[1], [0], [0], [1], [0, 0, 1, 1], [], []>} : vector<128x4xf32>, vector<4x32xf32>, vector<128x32xf32> -> vector<128x32xf32>
    %10 = arith.addf %4, %9 : vector<128x32xf32>
    %c0_10 = arith.constant 0 : index
    %c32 = arith.constant 32 : index
    %c0_11 = arith.constant 0 : index
    %11 = vector.load %arg1[%c0_10, %c32, %c0_11] : memref<1x160x4xf32, #tpu.memory_space<vmem>>, vector<1x128x4xf32>
    %12 = vector.shape_cast %11 : vector<1x128x4xf32> to vector<128x4xf32>
    %c2 = arith.constant 2 : index
    %c0_12 = arith.constant 0 : index
    %c0_13 = arith.constant 0 : index
    %13 = vector.load %arg2[%c2, %c0_12, %c0_13] : memref<3x4x32xf32, #tpu.memory_space<vmem>>, vector<1x4x32xf32>
    %14 = vector.shape_cast %13 : vector<1x4x32xf32> to vector<4x32xf32>
    %cst_14 = arith.constant dense<0.000000e+00> : vector<128x32xf32>
    %15 = tpu.matmul %12, %14, %cst_14 {dimension_numbers = #tpu.dot_dimension_numbers<[1], [0], [0], [1], [0, 0, 1, 1], [], []>} : vector<128x4xf32>, vector<4x32xf32>, vector<128x32xf32> -> vector<128x32xf32>
    %16 = arith.addf %10, %15 : vector<128x32xf32>
    %c0_15 = arith.constant 0 : index
    %c0_16 = arith.constant 0 : index
    %17 = vector.load %arg3[%c0_15, %c0_16] : memref<1x32xf32, #tpu.memory_space<vmem>>, vector<1x32xf32>
    %18 = vector.shape_cast %17 : vector<1x32xf32> to vector<32xf32>
    %19 = vector.shape_cast %18 : vector<32xf32> to vector<1x32xf32>
    %20 = vector.broadcast %19 : vector<1x32xf32> to vector<128x32xf32>
    %21 = arith.addf %16, %20 : vector<128x32xf32>
    %c0_17 = arith.constant 0 : index
    %c0_18 = arith.constant 0 : index
    %c0_19 = arith.constant 0 : index
    %22 = vector.load %arg5[%c0_17, %c0_18, %c0_19] : memref<1x128x32xf32, #tpu.memory_space<vmem>>, vector<1x128x32xf32>
    %23 = vector.shape_cast %22 : vector<1x128x32xf32> to vector<128x32xf32>
    %24 = vector.shape_cast %21 : vector<128x32xf32> to vector<1x128x32xf32>
    tpu.vector_store %arg5[%c0_17, %c0_18, %c0_19], %24 {strides = array<i32>} : memref<1x128x32xf32, #tpu.memory_space<vmem>>, vector<1x128x32xf32>,
    %c0_i32 = arith.constant 0 : i32
    %c8_i32 = arith.constant 8 : i32
    %25 = arith.addi %c0_i32, %c8_i32 : i32
    %c1_i32 = arith.constant 1 : i32
    scf.for %arg6 = %c0_i32 to %25 step %c1_i32  : i32 {
      %c16_i32 = arith.constant 16 : i32
      %26 = arith.muli %arg6, %c16_i32 : i32
      %27 = tpu.assume_multiple %26, 16 : i32
      %c0_21 = arith.constant 0 : index
      %28 = arith.index_cast %27 : i32 to index
      %c0_22 = arith.constant 0 : index
      %29 = vector.load %arg5[%c0_21, %28, %c0_22] : memref<1x128x32xf32, #tpu.memory_space<vmem>>, vector<1x16x32xf32>
      %30 = vector.shape_cast %29 : vector<1x16x32xf32> to vector<16x32xf32>
      %cst_23 = arith.constant dense<0.000000e+00> : vector<16x16xf32>
      %31 = tpu.matmul %30, %30, %cst_23 {dimension_numbers = #tpu.dot_dimension_numbers<[1], [1], [0], [0], [0, 0, 1, 0], [], []>} : vector<16x32xf32>, vector<16x32xf32>, vector<16x16xf32> -> vector<16x16xf32>
      %32 = arith.negf %31 : vector<16x16xf32>
      %33 = math.exp %32 : vector<16x16xf32>
      %cst_24 = arith.constant 1.000000e+00 : f32
      %34 = vector.broadcast %cst_24 : f32 to vector<16x16xf32>
      %35 = arith.addf %34, %33 : vector<16x16xf32>
      %36 = arith.divf %34, %35 : vector<16x16xf32>
      %c0_25 = arith.constant 0 : index
      %37 = arith.index_cast %arg6 : i32 to index
      %c0_26 = arith.constant 0 : index
      %c0_27 = arith.constant 0 : index
      %38 = vector.load %arg4[%c0_25, %37, %c0_26, %c0_27] : memref<1x8x16x16xf32, #tpu.memory_space<vmem>>, vector<1x1x16x16xf32>
      %39 = vector.shape_cast %38 : vector<1x1x16x16xf32> to vector<16x16xf32>
      %40 = vector.shape_cast %36 : vector<16x16xf32> to vector<1x1x16x16xf32>
      tpu.vector_store %arg4[%c0_25, %37, %c0_26, %c0_27], %40 {strides = array<i32>} : memref<1x8x16x16xf32, #tpu.memory_space<vmem>>, vector<1x1x16x16xf32>,
    }
    %c8_i32_20 = arith.constant 8 : i32
    return
  }
  func.func @transform_0(%arg0: i32) -> (i32, i32, i32) {
    %c0_i32 = arith.constant 0 : i32
    %c0_i32_0 = arith.constant 0 : i32
    %c0_i32_1 = arith.constant 0 : i32
    return %arg0, %c0_i32, %c0_i32_0 : i32, i32, i32
  }
  func.func @transform_1(%arg0: i32) -> (i32, i32, i32) {
    %c0_i32 = arith.constant 0 : i32
    %c0_i32_0 = arith.constant 0 : i32
    %c0_i32_1 = arith.constant 0 : i32
    %c0_i32_2 = arith.constant 0 : i32
    return %c0_i32, %c0_i32_0, %c0_i32_1 : i32, i32, i32
  }
  func.func @transform_2(%arg0: i32) -> (i32, i32) {
    %c0_i32 = arith.constant 0 : i32
    %c0_i32_0 = arith.constant 0 : i32
    %c0_i32_1 = arith.constant 0 : i32
    return %c0_i32, %c0_i32_0 : i32, i32
  }
  func.func @transform_3(%arg0: i32) -> (i32, i32, i32, i32) {
    %c0_i32 = arith.constant 0 : i32
    %c0_i32_0 = arith.constant 0 : i32
    %c0_i32_1 = arith.constant 0 : i32
    %c0_i32_2 = arith.constant 0 : i32
    return %arg0, %c0_i32, %c0_i32_0, %c0_i32_1 : i32, i32, i32, i32
  }
}

</mosaic_0001>

<bundles_post_ra>
// kernel: tpu_custom_call.1
= control target key start
LH: loop header
LB: loop body
LE: loop exit
PB: predicated region body
PF: predicated region fallthrough
CT: control target
= control target key end

     0   :  { %8 = vsyncpa [#allocation4], 0  ;;  %s1216_s0 = inlined_call_operand.vmem [shape: f32[2,160,4], index: 0, kind: input, shape index: {}]   ;;  %s1217_s1 = inlined_call_operand.vmem [shape: f32[3,4,32], index: 1, kind: input, shape index: {}]   ;;  %s1218_s2 = inlined_call_operand.vmem [shape: f32[1,32], index: 2, kind: input, shape index: {}]   ;;  %s1219_s3 = inlined_call_operand.hbm [shape: f32[2,8,16,16], index: 3, kind: output, shape index: {}]  }
   0x1   :  { %10 = vsyncpa [#allocation4 + $0x1], 0  ;;  %s967_s12 = smov 0   ;;  %s969_s13 = smov 0  }
   0x2   :  { %s971_s14 = smov 0   ;;  %s973_s15 = smov 0  }
   0x3 LB: > { %s988_s16 = sadd.s32 4294967295, %s939_s15   ;;  %s737_s17 = sadd.s32 4294967294, %s939_s15   ;;  %s939_s15 = sphi %s973_s15, %s1225_s15   ;;  %s935_s14 = sphi %s971_s14, %s1224_s14   ;;  %s931_s13 = sphi %s969_s13, %s1223_s13   ;;  %s927_s12 = sphi %s967_s12, %s1222_s12  }
   0x4   : > { %s992_s18 = sadd.s32 1, %s939_s15   ;;  %s91_s19 = sadd.s32 1, %s935_s14 }
   0x5   : > { %s88_s20 = ssub.s32 %s939_s15, %s992_s18  ;;  %p101_p0 = scmp.ne.s32.totalorder %s935_s14, %s931_s13 }
   0x6   : > { %p89_p1 = scmp.eq.s32.totalorder %s88_s20, 0  ;;  %p102_p2 = scmp.eq.s32.totalorder %s988_s16, 1 }
   0x7   : > { %p107_p3 = scmp.ne.s32.totalorder %s931_s13, %s927_s12  ;;  %p108_p4 = scmp.eq.s32.totalorder %s737_s17, 1 }
   0x8   : > { %s1003_s21 = scalar_select %p89_p1, %s935_s14, %s91_s19  }
   0x9   : > { %p1005_p5 = por %p102_p2, %p101_p0  ;;  %p1009_p6 = por %p108_p4, %p107_p3 }
   0xa   : > { %p740_p7 = scmp.ge.s32.totalorder %s939_s15, 1  ;;  %p140_p8 = scmp.lt.s32.totalorder %s939_s15, 3 }
   0xc   : > { %p141_p9 = pnand %p740_p7, %p140_p8 }
   0xd   : > { %p164_p10 = scmp.lt.s32.totalorder (!%p141_p9), %s988_s16, 1  ;;  %s161_s30 = sand.u32 (!%p141_p9), 1, %s931_s13  }
   0xe   : > { %144 = sbr.rel (%p141_p9) target bundleno = 424 (0x1a8), region = 32  ;;  %s1033_s5 = sshll.u32 (!%p141_p9), %s161_s30, 7 }
   0xf   : > { %s163_s17 = scalar_lea.vmem (!%p141_p9), [#allocation3], %s1033_s5  ;;  %s1160_s19 = smov (!%p141_p9), 0  }
  0x13   : > { %v743_v0 = vld [vmem:[%s1217_s1 + $0x4] sm:$0xf]  ;;  %vm239_vm0 = vcmask 1043456   ;;  %v778_v1 = vld [vmem:[%s1217_s1 + $0x8] sm:$0xf]  ;;  %s165_s4 = scalar_select %p164_p10, %s988_s16, 1 }
  0x14   : > { %809 = vmatpush.msk.msra.mxu3 %vm239_vm0, %v743_v0  ;;  %779 = vmatpush.msk.msra.mxu2 %vm239_vm0, %v778_v1  ;;  %v185_v2 = vld [vmem:[%s1217_s1] sm:$0xf]  ;;  %vm190_vm1 = vcmask 31744   ;;  %vm552_vm2 = vcmask 261120  }
  0x15   : > { %744 = vmatpush.msk.msra.mxu0 %vm239_vm0, %v743_v0  ;;  %761 = vmatpush.msk.msra.mxu1 %vm239_vm0, %v185_v2  ;;  %s814_s6 = smul.u32 160, %s165_s4  ;;  %v1113_v26 = vld [vmem:[%s1218_s2] ss:$0 sm:$0xff] }
  0x16   : > { %810 = vmatpush.msk.msrb.mxu3 %vm239_vm0, %v185_v2 }
  0x17   : > { %s1039_s9 = scalar_lea.vmem %s1216_s0, %s814_s6 }
  0x18   : > { %v183_v3 = vld [vmem:[%s1039_s9 + $0x70] sm:$0xff]  ;;  %v382_v4 = vld [vmem:[%s1039_s9 + $0x20] sm:$0xff]  ;;  %v184_v7 = vld [vmem:[%s1039_s9 + $0x78] sm:$0xff] }
  0x19   : > { %v171_v5 = vld [vmem:[%s1039_s9 + $0x10] sm:$0xff]  ;;  %757 = vmatmul.msk.f32.vlgmr.msra.gmra.mxu3 %vm190_vm1, %v183_v3  ;;  %780 = vmatmul.msk.f32.vlgmr.msra.gmra.mxu2 %vm190_vm1, %v382_v4  ;;  %v169_v6 = vld [vmem:[%s1039_s9] sm:$0xff]  ;;  %v383_v8 = vld [vmem:[%s1039_s9 + $0x28] sm:$0xff] }
  0x1a   : > { %745 = vmatmul.msk.f32.vlgmr.msra.gmra.mxu0 %vm190_vm1, %v171_v5  ;;  %762 = vmatmul.msk.f32.vlgmr.msra.gmra.mxu1 %vm190_vm1, %v169_v6  ;;  %v172_v9 = vld [vmem:[%s1039_s9 + $0x18] sm:$0xff]  ;;  %v170_v10 = vld [vmem:[%s1039_s9 + $0x8] sm:$0xff]  ;;  %v186_v11 = vld [vmem:[%s1039_s9 + $0x80] sm:$0xff] }
  0x1b   : > { %811 = vmatpush.msk.msra.mxu3 %vm239_vm0, %v778_v1  ;;  %v384_v12 = vld [vmem:[%s1039_s9 + $0x30] sm:$0xff]  ;;  %v187_v13 = vld [vmem:[%s1039_s9 + $0x88] sm:$0xff]  ;;  %v385_v14 = vld [vmem:[%s1039_s9 + $0x38] sm:$0xff] }
  0x1c   : > { %v181_v15 = vld [vmem:[%s1039_s9 + $0x60] sm:$0xff]  ;;  %v182_v17 = vld [vmem:[%s1039_s9 + $0x68] sm:$0xff]  ;;  %v388_v19 = vld [vmem:[%s1039_s9 + $0x50] sm:$0xff] }
  0x1d   : > { %v386_v16 = vld [vmem:[%s1039_s9 + $0x40] sm:$0xff]  ;;  %v387_v18 = vld [vmem:[%s1039_s9 + $0x48] sm:$0xff]  ;;  %v389_v20 = vld [vmem:[%s1039_s9 + $0x58] sm:$0xff] }
  0x1e   : > { %v396_v21 = vld [vmem:[%s1039_s9 + $0x90] sm:$0xff]  ;;  %v397_v22 = vld [vmem:[%s1039_s9 + $0x98] sm:$0xff] }
  0x21   : > { %758 = vmatmul.msk.f32.gmra.mxu3 %vm190_vm1, %v184_v7  ;;  %781 = vmatmul.msk.f32.gmra.mxu2 %vm190_vm1, %v383_v8 }
  0x22   : > { %746 = vmatmul.msk.f32.gmra.mxu0 %vm190_vm1, %v172_v9  ;;  %763 = vmatmul.msk.f32.gmra.mxu1 %vm190_vm1, %v170_v10 }
  0x29   : > { %759 = vmatmul.msk.f32.gmra.mxu3 %vm190_vm1, %v186_v11  ;;  %782 = vmatmul.msk.f32.gmra.mxu2 %vm190_vm1, %v384_v12 }
  0x2a   : > { %747 = vmatmul.msk.f32.gmra.mxu0 %vm190_vm1, %v382_v4  ;;  %764 = vmatmul.msk.f32.gmra.mxu1 %vm190_vm1, %v171_v5 }
  0x31   : > { %760 = vmatmul.msk.f32.gmra.mxu3 %vm190_vm1, %v187_v13  ;;  %783 = vmatmul.msk.f32.gmra.mxu2 %vm190_vm1, %v385_v14 }
  0x32   : > { %748 = vmatmul.msk.f32.gmra.mxu0 %vm190_vm1, %v383_v8  ;;  %765 = vmatmul.msk.f32.gmra.mxu1 %vm190_vm1, %v172_v9 }
  0x39   : > { %774 = vmatmul.msk.f32.vlgmr.msrb.gmra.mxu3 %vm190_vm1, %v181_v15  ;;  %784 = vmatmul.msk.f32.gmra.mxu2 %vm190_vm1, %v386_v16 }
  0x3a   : > { %749 = vmatmul.msk.f32.gmra.mxu0 %vm190_vm1, %v384_v12  ;;  %766 = vmatmul.msk.f32.gmra.mxu1 %vm190_vm1, %v382_v4 }
  0x41   : > { %775 = vmatmul.msk.f32.gmra.mxu3 %vm190_vm1, %v182_v17  ;;  %785 = vmatmul.msk.f32.gmra.mxu2 %vm190_vm1, %v387_v18 }
  0x42   : > { %750 = vmatmul.msk.f32.gmra.mxu0 %vm190_vm1, %v385_v14  ;;  %767 = vmatmul.msk.f32.gmra.mxu1 %vm190_vm1, %v383_v8 }
  0x49   : > { %776 = vmatmul.msk.f32.gmra.mxu3 %vm190_vm1, %v183_v3  ;;  %786 = vmatmul.msk.f32.gmra.mxu2 %vm190_vm1, %v388_v19 }
  0x4a   : > { %751 = vmatmul.msk.f32.gmra.mxu0 %vm190_vm1, %v386_v16  ;;  %768 = vmatmul.msk.f32.gmra.mxu1 %vm190_vm1, %v384_v12 }
  0x51   : > { %777 = vmatmul.msk.f32.gmra.mxu3 %vm190_vm1, %v184_v7  ;;  %787 = vmatmul.msk.f32.gmra.mxu2 %vm190_vm1, %v389_v20 }
  0x52   : > { %752 = vmatmul.msk.f32.gmra.mxu0 %vm190_vm1, %v387_v18  ;;  %769 = vmatmul.msk.f32.gmra.mxu1 %vm190_vm1, %v385_v14 }
  0x59   : > { %788 = vmatmul.msk.f32.gmra.mxu2 %vm190_vm1, %v181_v15  ;;  %792 = vmatmul.msk.f32.vlgmr.msra.gmra.mxu3 %vm190_vm1, %v186_v11 }
  0x5a   : > { %753 = vmatmul.msk.f32.gmra.mxu0 %vm190_vm1, %v388_v19  ;;  %770 = vmatmul.msk.f32.gmra.mxu1 %vm190_vm1, %v386_v16 }
  0x61   : > { %789 = vmatmul.msk.f32.gmra.mxu2 %vm190_vm1, %v182_v17  ;;  %793 = vmatmul.msk.f32.gmra.mxu3 %vm190_vm1, %v187_v13 }
  0x62   : > { %754 = vmatmul.msk.f32.gmra.mxu0 %vm190_vm1, %v389_v20  ;;  %771 = vmatmul.msk.f32.gmra.mxu1 %vm190_vm1, %v387_v18 }
  0x69   : > { %790 = vmatmul.msk.f32.gmra.mxu2 %vm190_vm1, %v183_v3  ;;  %794 = vmatmul.msk.f32.gmra.mxu3 %vm190_vm1, %v396_v21 }
  0x6a   : > { %755 = vmatmul.msk.f32.gmra.mxu0 %vm190_vm1, %v181_v15  ;;  %772 = vmatmul.msk.f32.gmra.mxu1 %vm190_vm1, %v388_v19 }
  0x71   : > { %791 = vmatmul.msk.f32.gmra.mxu2 %vm190_vm1, %v184_v7  ;;  %795 = vmatmul.msk.f32.gmra.mxu3 %vm190_vm1, %v397_v22 }
  0x72   : > { %756 = vmatmul.msk.f32.gmra.mxu0 %vm190_vm1, %v182_v17  ;;  %773 = vmatmul.msk.f32.gmra.mxu1 %vm190_vm1, %v389_v20 }
  0x97   : > { %v260_v23 = vpop.f32.mrf.mxu0  ;;  %v334_v24 = vpop.f32.mrf.mxu1 }
  0x98   : > { %v335_v25 = vadd.f32 %v334_v24, %v260_v23 }
  0x9c   : > { %v1115_v27 = vpop.f32.mrf.mxu3  ;;  %v468_v28 = vpop.f32.mrf.mxu2 }
  0x9d   : > { %v516_v29 = vadd.f32 %v468_v28, %v335_v25 }
  0x9f   : > { %v536_v30 = vadd.f32 %v1113_v26, %v516_v29  ;;  %v263_v31 = vpop.f32.mrf.mxu0  ;;  %v337_v32 = vpop.f32.mrf.mxu1 }
  0xa0   : > { %v338_v33 = vadd.f32 %v337_v32, %v263_v31 }
  0xa1   : > { %553 = vst.msk [vmem:[#allocation2] sm:$0xff] %vm552_vm2, %v536_v30 }
  0xa4   : > { %v1119_v34 = vpop.f32.mrf.mxu3  ;;  %v471_v35 = vpop.f32.mrf.mxu2 }
  0xa5   : > { %v517_v36 = vadd.f32 %v471_v35, %v338_v33 }
  0xa7   : > { %v537_v37 = vadd.f32 %v1113_v26, %v517_v36  ;;  %v266_v38 = vpop.f32.mrf.mxu0  ;;  %v340_v39 = vpop.f32.mrf.mxu1 }
  0xa8   : > { %v341_v40 = vadd.f32 %v340_v39, %v266_v38 }
  0xa9   : > { %554 = vst.msk [vmem:[#allocation2 + $0x8] sm:$0xff] %vm552_vm2, %v537_v37 }
  0xac   : > { %v1123_v41 = vpop.f32.mrf.mxu3  ;;  %v474_v42 = vpop.f32.mrf.mxu2 }
  0xad   : > { %v518_v43 = vadd.f32 %v474_v42, %v341_v40 }
  0xaf   : > { %v538_v44 = vadd.f32 %v1113_v26, %v518_v43  ;;  %v269_v45 = vpop.f32.mrf.mxu0  ;;  %v343_v46 = vpop.f32.mrf.mxu1 }
  0xb0   : > { %v344_v47 = vadd.f32 %v343_v46, %v269_v45 }
  0xb1   : > { %555 = vst.msk [vmem:[#allocation2 + $0x10] sm:$0xff] %vm552_vm2, %v538_v44 }
  0xb4   : > { %v1127_v48 = vpop.f32.mrf.mxu3  ;;  %v477_v49 = vpop.f32.mrf.mxu2 }
  0xb5   : > { %v519_v50 = vadd.f32 %v477_v49, %v344_v47 }
  0xb7   : > { %v539_v51 = vadd.f32 %v1113_v26, %v519_v50  ;;  %v272_v52 = vpop.f32.mrf.mxu0  ;;  %v346_v53 = vpop.f32.mrf.mxu1 }
  0xb8   : > { %v347_v54 = vadd.f32 %v346_v53, %v272_v52 }
  0xb9   : > { %556 = vst.msk [vmem:[#allocation2 + $0x18] sm:$0xff] %vm552_vm2, %v539_v51 }
  0xbc   : > { %v370_v55 = vpop.f32.mrf.mxu3  ;;  %v480_v56 = vpop.f32.mrf.mxu2 }
  0xbd   : > { %v520_v57 = vadd.f32 %v480_v56, %v347_v54  ;;  %v371_v19 = vadd.f32 %v370_v55, %v1115_v27 }
  0xbf   : > { %v540_v58 = vadd.f32 %v1113_v26, %v520_v57  ;;  %v275_v59 = vpop.f32.mrf.mxu0  ;;  %v349_v60 = vpop.f32.mrf.mxu1 }
  0xc0   : > { %v350_v61 = vadd.f32 %v349_v60, %v275_v59 }
  0xc1   : > { %557 = vst.msk [vmem:[#allocation2 + $0x20] sm:$0xff] %vm552_vm2, %v540_v58 }
  0xc4   : > { %v373_v62 = vpop.f32.mrf.mxu3  ;;  %v483_v63 = vpop.f32.mrf.mxu2 }
  0xc5   : > { %v521_v0 = vadd.f32 %v483_v63, %v350_v61  ;;  %v374_v31 = vadd.f32 %v373_v62, %v1119_v34 }
  0xc7   : > { %v541_v1 = vadd.f32 %v1113_v26, %v521_v0  ;;  %v278_v2 = vpop.f32.mrf.mxu0  ;;  %v352_v3 = vpop.f32.mrf.mxu1 }
  0xc8   : > { %v353_v4 = vadd.f32 %v352_v3, %v278_v2 }
  0xc9   : > { %558 = vst.msk [vmem:[#allocation2 + $0x28] sm:$0xff] %vm552_vm2, %v541_v1 }
  0xcc   : > { %v376_v5 = vpop.f32.mrf.mxu3  ;;  %v486_v6 = vpop.f32.mrf.mxu2 }
  0xcd   : > { %v522_v7 = vadd.f32 %v486_v6, %v353_v4  ;;  %v377_v42 = vadd.f32 %v376_v5, %v1123_v41 }
  0xcf   : > { %v542_v8 = vadd.f32 %v1113_v26, %v522_v7  ;;  %v281_v9 = vpop.f32.mrf.mxu0  ;;  %v355_v10 = vpop.f32.mrf.mxu1 }
  0xd0   : > { %v356_v11 = vadd.f32 %v355_v10, %v281_v9 }
  0xd1   : > { %559 = vst.msk [vmem:[#allocation2 + $0x30] sm:$0xff] %vm552_vm2, %v542_v8 }
  0xd4   : > { %v379_v12 = vpop.f32.mrf.mxu3  ;;  %v489_v13 = vpop.f32.mrf.mxu2 }
  0xd5   : > { %v523_v14 = vadd.f32 %v489_v13, %v356_v11  ;;  %v380_v52 = vadd.f32 %v379_v12, %v1127_v48 }
  0xd7   : > { %v543_v15 = vadd.f32 %v1113_v26, %v523_v14  ;;  %v284_v16 = vpop.f32.mrf.mxu0  ;;  %v358_v17 = vpop.f32.mrf.mxu1 }
  0xd8   : > { %v359_v18 = vadd.f32 %v358_v17, %v284_v16 }
  0xd9   : > { %560 = vst.msk [vmem:[#allocation2 + $0x38] sm:$0xff] %vm552_vm2, %v543_v15 }
  0xdc   : > { %v492_v20 = vpop.f32.mrf.mxu2  ;;  %v504_v21 = vpop.f32.mrf.mxu3 }
  0xdd   : > { %v524_v22 = vadd.f32 %v492_v20, %v359_v18  ;;  %v528_v23 = vadd.f32 %v504_v21, %v371_v19 }
  0xdf   : > { %v544_v24 = vadd.f32 %v1113_v26, %v524_v22  ;;  %v548_v25 = vadd.f32 %v1113_v26, %v528_v23  ;;  %v287_v28 = vpop.f32.mrf.mxu0  ;;  %v361_v29 = vpop.f32.mrf.mxu1 }
  0xe0   : > { %v362_v30 = vadd.f32 %v361_v29, %v287_v28 }
  0xe1   : > { %561 = vst.msk [vmem:[#allocation2 + $0x40] sm:$0xff] %vm552_vm2, %v544_v24 }
  0xe2   : > { %565 = vst.msk [vmem:[#allocation2 + $0x60] sm:$0xff] %vm552_vm2, %v548_v25 }
  0xe4   : > { %v495_v32 = vpop.f32.mrf.mxu2  ;;  %v507_v33 = vpop.f32.mrf.mxu3 }
  0xe5   : > { %v525_v27 = vadd.f32 %v495_v32, %v362_v30  ;;  %v529_v35 = vadd.f32 %v507_v33, %v374_v31 }
  0xe7   : > { %v545_v36 = vadd.f32 %v1113_v26, %v525_v27  ;;  %v549_v37 = vadd.f32 %v1113_v26, %v529_v35  ;;  %v290_v38 = vpop.f32.mrf.mxu0  ;;  %v364_v39 = vpop.f32.mrf.mxu1 }
  0xe8   : > { %v365_v40 = vadd.f32 %v364_v39, %v290_v38 }
  0xe9   : > { %562 = vst.msk [vmem:[#allocation2 + $0x48] sm:$0xff] %vm552_vm2, %v545_v36 }
  0xea   : > { %566 = vst.msk [vmem:[#allocation2 + $0x68] sm:$0xff] %vm552_vm2, %v549_v37 }
  0xec   : > { %v498_v43 = vpop.f32.mrf.mxu2  ;;  %v510_v44 = vpop.f32.mrf.mxu3 }
  0xed   : > { %v526_v34 = vadd.f32 %v498_v43, %v365_v40  ;;  %v530_v45 = vadd.f32 %v510_v44, %v377_v42 }
  0xef   : > { %v546_v46 = vadd.f32 %v1113_v26, %v526_v34  ;;  %v550_v47 = vadd.f32 %v1113_v26, %v530_v45  ;;  %v293_v49 = vpop.f32.mrf.mxu0  ;;  %v367_v50 = vpop.f32.mrf.mxu1 }
  0xf0   : > { %v368_v51 = vadd.f32 %v367_v50, %v293_v49 }
  0xf1   : > { %563 = vst.msk [vmem:[#allocation2 + $0x50] sm:$0xff] %vm552_vm2, %v546_v46 }
  0xf2   : > { %567 = vst.msk [vmem:[#allocation2 + $0x70] sm:$0xff] %vm552_vm2, %v550_v47 }
  0xf4   : > { %v501_v53 = vpop.f32.mrf.mxu2  ;;  %v513_v41 = vpop.f32.mrf.mxu3 }
  0xf5   : > { %v527_v54 = vadd.f32 %v501_v53, %v368_v51  ;;  %v531_v55 = vadd.f32 %v513_v41, %v380_v52 }
  0xf7   : > { %v547_v56 = vadd.f32 %v1113_v26, %v527_v54  ;;  %v551_v57 = vadd.f32 %v1113_v26, %v531_v55 }
  0xf9   : > { %564 = vst.msk [vmem:[#allocation2 + $0x58] sm:$0xff] %vm552_vm2, %v547_v56 }
  0xfa   : > { %568 = vst.msk [vmem:[#allocation2 + $0x78] sm:$0xff] %vm552_vm2, %v551_v57 }
  0xfb LB: >> { %s796_s20 = sshll.u32 %s943_s19, 4  ;;  %vm647_vm7 = vcmask 130048   ;;  %s574_s19 = sadd.s32 1, %s943_s19   ;;  %s943_s19 = sphi %s1160_s19, %s574_s19  }
  0xfc   : >> { %s576_s24 = scalar_lea.vmem [#allocation2], %s796_s20  ;;  %s646_s25 = scalar_lea.vmem %s163_s17, %s796_s20 [#allocation3] }
  0xfd   : >> { %p571_p11 = scmp.ge.s32.totalorder %s574_s19, 8  }
  0xfe   : > { %s808_s26 = sshll.u32 (%p571_p11), %s988_s16, 7  ;;  %s663_s4 = sshll.u32 (%p571_p11), %s163_s17, 4  ;;  %s664_s4 = int_to_ptr.vmem [resolvable:$true] %s663_s4 }
  0xff   : > { %s662_s29 = scalar_lea.hbm (%p571_p11), %s1219_s3, %s808_s26  ;;  %s651_s7 = scalar_lea.sflag (%p571_p11), [#allocation4], %s161_s30 }
 0x100   : > { %s665_s6 = sshll.u32 (%p571_p11), %s662_s29, 4  ;;  %s893_s11 = scalar_lea.hbm (%p571_p11), %s1219_s3, 256  ;;  %s666_s6 = int_to_ptr.hbm [resolvable:$true] %s665_s6 }
 0x101   : >> { %v578_v48 = vld [vmem:[%s576_s24 + $0x8] sm:$0xff]  ;;  %v577_v26 = vld [vmem:[%s576_s24] sm:$0xff]  ;;  %s887_s8 = sshra.s32 (%p571_p11), %s666_s6, 4  ;;  %s888_s8 = int_to_ptr.hbm [resolvable:$true] %s887_s8 }
 0x102   : >> { %797 = vmatpush.xpose.msk.msra.mxu0 %vm552_vm2, %v578_v48  ;;  %812 = vmatpush.xpose.msk.msra.mxu1 %vm552_vm2, %v578_v48  ;;  %s889_s9 = scalar_lea.hbm (%p571_p11), %s888_s8, 128  ;;  %p894_p1 = scmp.lt.s32.totalorder (%p571_p11), %s888_s8, %s1219_s3 }
 0x103   : > { %p890_p12 = scmp.ne.s32.totalorder (%p571_p11), %s888_s8, %s889_s9  ;;  %p895_p2 = scmp.lt.s32.totalorder (%p571_p11), %s893_s11, %s889_s9 }
 0x105   : > { %p891_p13 = pnand (%p571_p11), %p890_p12, %p1005_p5  ;;  %p896_p3 = por (%p571_p11), %p895_p2, %p894_p1 }
 0x106   : >> { %798 = vmatpush.xpose.msk.msra.mxu0 %vm552_vm2, %v577_v26  ;;  %813 = vmatpush.xpose.msk.msra.mxu1 %vm552_vm2, %v577_v26 }
 0x107   : > { %p892_p0 = pneg (%p571_p11), %p891_p13 }
 0x109   : >> { %799 = vmatmul.msk.f32.vlgmr.msra.gmra.mxu0 %vm552_vm2, %v577_v26  ;;  %800 = vmatmul.msk.f32.vlgmr.msra.gmra.mxu1 %vm552_vm2, %v578_v48  ;;  %p897_p4 = pnand (%p571_p11), %p896_p3, %p892_p0 }
 0x186   : >> { %v602_v58 = vpop.f32.mrf.mxu0  ;;  %v605_v59 = vpop.f32.mrf.mxu1 }
 0x187   : >> { %v801_v60 = vmul.f32 -1.442695, %v602_v58  ;;  %v802_v61 = vmul.f32 -1.442695, %v605_v59 }
 0x189   : >> { %865 = vpow2.f32 %v801_v60 }
 0x18a   : >> { %867 = vpow2.f32 %v802_v61 }
 0x18f   : >> { %v866_v62 = vpop.eup %865 }
 0x190   : >> { %v868_v63 = vpop.eup %867  ;;  %v614_v0 = vadd.f32 1.0, %v866_v62 }
 0x191   : >> { %v615_v1 = vadd.f32 1.0, %v868_v63 }
 0x192   : >> { %869 = vrcp.f32 %v614_v0  ;;  %v627_v7 = vand.u32 2147483648, %v614_v0  ;;  %v625_v10 = vand.u32 2147483647, %v614_v0  ;;  %vm621_vm5 = vweird.f32 %v614_v0 }
 0x193   : >> { %871 = vrcp.f32 %v615_v1  ;;  %v642_v11 = vand.u32 2147483648, %v615_v1  ;;  %v640_v13 = vand.u32 2147483647, %v615_v1  ;;  %vm636_vm8 = vweird.f32 %v615_v1 }
 0x194   : >> { %v628_v15 = vor.u32 1.1754944e-38, %v627_v7  ;;  %vm626_vm9 = vcmp.eq.f32.partialorder %v625_v10, 8.507059e+37 }
 0x195   : >> { %v643_v18 = vor.u32 1.1754944e-38, %v642_v11  ;;  %vm641_vm11 = vcmp.eq.f32.partialorder %v640_v13, 8.507059e+37 }
 0x198   : >> { %v870_v2 = vpop.eup %869 }
 0x199   : >> { %v872_v3 = vpop.eup %871  ;;  %v617_v4 = vmul.f32 %v870_v2, %v614_v0  ;;  %vm622_vm3 = vweird.f32 %v870_v2 }
 0x19a   : >> { %v632_v5 = vmul.f32 %v872_v3, %v615_v1  ;;  %vm637_vm4 = vweird.f32 %v872_v3  ;;  %vm623_vm6 = vmor %vm621_vm5, %vm622_vm3 }
 0x19b   : >> { %v618_v6 = vsub.f32 1.0, %v617_v4  ;;  %vm638_vm10 = vmor %vm636_vm8, %vm637_vm4 }
 0x19c   : >> { %v633_v8 = vsub.f32 1.0, %v632_v5 }
 0x19d   : >> { %v619_v9 = vmul.f32 %v870_v2, %v618_v6 }
 0x19e   : >> { %v634_v12 = vmul.f32 %v872_v3, %v633_v8 }
 0x19f   : >> { %v620_v14 = vadd.f32 %v870_v2, %v619_v9 }
 0x1a0   : >> { %v635_v16 = vadd.f32 %v872_v3, %v634_v12  ;;  %573 = sbr.rel (!%p571_p11) target bundleno = 251 (0xfb), region = 78 }
 0x1a1   : >> { %v624_v17 = vsel %vm623_vm6, %v870_v2, %v620_v14 }
 0x1a2   : >> { %v629_v19 = vsel %vm626_vm9, %v628_v15, %v624_v17  ;;  %v639_v20 = vsel %vm638_vm10, %v872_v3, %v635_v16 }
 0x1a3   : >> { %648 = vst.msk [vmem:[%s646_s25] sm:$0xff] %vm647_vm7, %v629_v19  ;;  %v644_v21 = vsel %vm641_vm11, %v643_v18, %v639_v20 }
 0x1a4   : >> { %649 = vst.msk [vmem:[%s646_s25 + $0x8] sm:$0xff] %vm647_vm7, %v644_v21 }
 0x1a5   : > { %900 = shalt.err (!%p897_p4)
}
 0x1a6   : > { %s945_s30 = smov 128   ;;  %s946_s5 = smov 8  }
 0x1a7   : > { %815 = dma.vmem_to_hbm [thread:$0]  (%p1005_p5), %s664_s4, 2048, %s666_s6, %s651_s7, %s945_s30, %s945_s30, %s946_s5  }
 0x1a8 PF: > { %p821_p7 = scmp.ge.s32.totalorder %s939_s15, 2  ;;  %s680_s17 = sand.u32 1, %s927_s12  }
 0x1a9   : > { %s681_s24 = scalar_lea.sflag [#allocation4], %s680_s17 }
 0x1aa   : > { %p818_p8 = pnand %p821_p7, %p1009_p6 }
 0x1ac   : > { %p819_p9 = pneg %p818_p8 }
 0x1ae   : > { %922 = dma.done.wait (%p819_p9), %s681_s24, 2048  }
 0x1af   : > { %924 = vsyncadd (%p819_p9), %s681_s24, 4294965248  ;;  %p13_p10 = scmp.ge.s32.totalorder %s992_s18, 4   ;;  %s1222_s12 = smov %s931_s13 }
 0x1b0   : > { %s1223_s13 = smov %s935_s14  ;;  %s1224_s14 = smov %s1003_s21 }
 0x1b1   : > { %s1225_s15 = smov %s992_s18  ;;  %15 = sbr.rel (!%p13_p10) target bundleno = 3 (0x3), region = 89 }
 0x1b6   :  { %687 = vsyncpa [#allocation4], 1 }
 0x1b7   :  { %689 = vsyncpa [#allocation4 + $0x1], 1 }

</bundles_post_ra>
